<compile_context>
chip_gen: v5e
topology: v5e:2x2
jax: 0.10.0
libtpu: 0.0.40
codegen_flags: <defaults>
</compile_context>

<pallas_src>
import jax
import jax.numpy as jnp
from jax.experimental import pallas as pl
from jax.experimental.pallas import tpu as pltpu


def _softmax_features(v, *, exact_recip=False):
    # numerically-stable softmax over the feature (sublane / axis-0) axis
    m = jnp.max(v, axis=0, keepdims=True)              # (1, tb)
    e = jnp.exp(v - m)
    s = jnp.sum(e, axis=0, keepdims=True)               # (1, tb)
    if exact_recip:
        return e / s
    # EUP approximate reciprocal: runs in the otherwise-idle EUP slot and
    # frees VPU slots in this VPU/EUP-bound kernel.
    return e * pl.reciprocal(s, approx=True)


def mlp_kernel(xT_ref, w1_ref, b1_ref, w2_ref, b2_ref, w3_ref, b3_ref, oT_ref):
    xT = xT_ref[...]                                                   # (F, tb)

    h = jnp.dot(w1_ref[...], xT, preferred_element_type=jnp.float32) + b1_ref[...]
    h = _softmax_features(h)                                           # (30, tb)

    h = jnp.dot(w2_ref[...], h, preferred_element_type=jnp.float32) + b2_ref[...]
    h = _softmax_features(h)                                           # (30, tb)

    h = jnp.dot(w3_ref[...], h, preferred_element_type=jnp.float32) + b3_ref[...]
    # exact reciprocal on the final, externally visible softmax
    oT_ref[...] = _softmax_features(h, exact_recip=True).astype(oT_ref.dtype)


def mlp_forward(x, params, *, tb=256):
    """x: (B, F) float32. Returns (B, 4) float32 softmax probabilities."""
    w1, b1, w2, b2, w3, b3 = params                    # W: (out,in), b: (out,1)
    B, F = x.shape
    H1, H2, O = w1.shape[0], w2.shape[0], w3.shape[0]
    assert w1.shape[1] == F and w2.shape[1] == H1 and w3.shape[1] == H2

    # Large batch tiles amortize per-grid-step overhead; keep tb a multiple of
    # 8 (f32 sublane pack) and never larger than the (padded) batch.
    tb = max(8, min(int(tb), pl.cdiv(B, 8) * 8))
    Bp = pl.cdiv(B, tb) * tb                           # pad batch to tile multiple
    grid = (Bp // tb,)

    xT = x.T                                           # (F, B): batch on lanes
    if Bp != B:
        xT = jnp.pad(xT, ((0, 0), (0, Bp - B)))

    full = lambda shape: pl.BlockSpec(shape, lambda i: (0, 0))

    cost = pl.CostEstimate(
        flops=2 * Bp * (F * H1 + H1 * H2 + H2 * O) + 6 * Bp * (H1 + H2 + O),
        transcendentals=Bp * (H1 + H2 + O),
        bytes_accessed=4 * (Bp * F + Bp * O + F * H1 + H1 * H2 + H2 * O
                            + H1 + H2 + O),
    )

    outT = pl.pallas_call(
        mlp_kernel,
        out_shape=jax.ShapeDtypeStruct((O, Bp), jnp.float32),
        grid=grid,
        in_specs=[
            pl.BlockSpec((F, tb), lambda i: (0, i)),   # xT tile: batch on lanes
            full((H1, F)),                             # W1 (out, in)
            full((H1, 1)),                             # b1
            full((H2, H1)),                            # W2
            full((H2, 1)),                             # b2
            full((O, H2)),                             # W3
            full((O, 1)),                              # b3
        ],
        out_specs=pl.BlockSpec((O, tb), lambda i: (0, i)),  # lane-dense store
        compiler_params=pltpu.CompilerParams(
            dimension_semantics=("parallel",),         # >=2 steps -> v7x megacore
        ),
        cost_estimate=cost,
    )(xT, w1, b1, w2, b2, w3, b3)

    return outT[:, :B].T                               # back to (B, 4)


def init_params(key, n_input_features=10):
    """Deterministic synthetic parameters in torch (out_features, in_features) storage."""
    k = jax.random.split(key, 6)
    w1 = jax.random.normal(k[0], (30, n_input_features), jnp.float32) * 0.1
    b1 = jax.random.normal(k[1], (30, 1), jnp.float32) * 0.1
    w2 = jax.random.normal(k[2], (30, 30), jnp.float32) * 0.1
    b2 = jax.random.normal(k[3], (30, 1), jnp.float32) * 0.1
    w3 = jax.random.normal(k[4], (4, 30), jnp.float32) * 0.1
    b3 = jax.random.normal(k[5], (4, 1), jnp.float32) * 0.1
    return (w1, b1, w2, b2, w3, b3)


def reference_forward(x, params):
    w1, b1, w2, b2, w3, b3 = params
    h = jax.nn.softmax(x @ w1.T + b1.T, axis=-1)
    h = jax.nn.softmax(h @ w2.T + b2.T, axis=-1)
    return jax.nn.softmax(h @ w3.T + b3.T, axis=-1)


if __name__ == "__main__":
    key = jax.random.PRNGKey(0)
    kx, kp = jax.random.split(key)

    B, F = 512, 10
    x = jax.random.normal(kx, (B, F), jnp.float32)
    params = init_params(kp, n_input_features=F)

    out = mlp_forward(x, params, tb=256)               # grid = (2,)
    out = jax.block_until_ready(out)

    ref = reference_forward(x, params)
    assert out.shape == (B, 4)
    # hidden-layer softmaxes use approx reciprocal -> slightly loosened tolerance
    assert jnp.allclose(out, ref, atol=1e-3, rtol=1e-3), "mismatch vs reference"
    # final softmax uses exact division, so rows still sum to 1 tightly
    assert jnp.allclose(jnp.sum(out, axis=-1), jnp.ones((B,)), atol=1e-4)

    print("KERNEL_OK")
</pallas_src>

<mosaic_0001>
module attributes {stable_mosaic.version = 11 : i64} {
  func.func @mlp_kernel(%arg0: i32, %arg1: memref<10x256xf32, #tpu.memory_space<vmem>>, %arg2: memref<30x10xf32, #tpu.memory_space<vmem>>, %arg3: memref<30x1xf32, #tpu.memory_space<vmem>>, %arg4: memref<30x30xf32, #tpu.memory_space<vmem>>, %arg5: memref<30x1xf32, #tpu.memory_space<vmem>>, %arg6: memref<4x30xf32, #tpu.memory_space<vmem>>, %arg7: memref<4x1xf32, #tpu.memory_space<vmem>>, %arg8: memref<4x256xf32, #tpu.memory_space<vmem>>) attributes {dimension_semantics = [#tpu.dimension_semantics<parallel>], iteration_bounds = array<i64: 2>, scalar_prefetch = 0 : i64, scratch_operands = 0 : i64, tpu.core_type = #tpu.core_type<tc>, window_params = [{transform_indices = @transform_0, window_bounds = array<i64: 10, 256>}, {pipeline_mode = #tpu.pipeline_mode<synchronous>, transform_indices = @transform_1, window_bounds = array<i64: 30, 10>}, {pipeline_mode = #tpu.pipeline_mode<synchronous>, transform_indices = @transform_2, window_bounds = array<i64: 30, 1>}, {pipeline_mode = #tpu.pipeline_mode<synchronous>, transform_indices = @transform_3, window_bounds = array<i64: 30, 30>}, {pipeline_mode = #tpu.pipeline_mode<synchronous>, transform_indices = @transform_4, window_bounds = array<i64: 30, 1>}, {pipeline_mode = #tpu.pipeline_mode<synchronous>, transform_indices = @transform_5, window_bounds = array<i64: 4, 30>}, {pipeline_mode = #tpu.pipeline_mode<synchronous>, transform_indices = @transform_6, window_bounds = array<i64: 4, 1>}, {transform_indices = @transform_7, window_bounds = array<i64: 4, 256>}]} {
    %c0 = arith.constant 0 : index
    %c0_0 = arith.constant 0 : index
    %0 = vector.load %arg1[%c0, %c0_0] : memref<10x256xf32, #tpu.memory_space<vmem>>, vector<10x256xf32>
    %c0_1 = arith.constant 0 : index
    %c0_2 = arith.constant 0 : index
    %1 = vector.load %arg2[%c0_1, %c0_2] : memref<30x10xf32, #tpu.memory_space<vmem>>, vector<30x10xf32>
    %cst = arith.constant dense<0.000000e+00> : vector<30x256xf32>
    %2 = tpu.matmul %1, %0, %cst {dimension_numbers = #tpu.dot_dimension_numbers<[1], [0], [0], [1], [0, 0, 1, 1], [], []>} : vector<30x10xf32>, vector<10x256xf32>, vector<30x256xf32> -> vector<30x256xf32>
    %c0_3 = arith.constant 0 : index
    %c0_4 = arith.constant 0 : index
    %3 = vector.load %arg3[%c0_3, %c0_4] : memref<30x1xf32, #tpu.memory_space<vmem>>, vector<30x1xf32>
    %4 = vector.broadcast %3 : vector<30x1xf32> to vector<30x256xf32>
    %5 = arith.addf %2, %4 : vector<30x256xf32>
    %cst_5 = arith.constant dense<0xFF800000> : vector<256xf32>
    %6 = vector.multi_reduction <maximumf>, %5, %cst_5 [0] : vector<30x256xf32> to vector<256xf32>
    %7 = vector.shape_cast %6 : vector<256xf32> to vector<1x256xf32>
    %8 = vector.broadcast %7 : vector<1x256xf32> to vector<30x256xf32>
    %9 = arith.subf %5, %8 : vector<30x256xf32>
    %10 = math.exp %9 : vector<30x256xf32>
    %cst_6 = arith.constant dense<0.000000e+00> : vector<256xf32>
    %11 = vector.multi_reduction <add>, %10, %cst_6 [0] : vector<30x256xf32> to vector<256xf32>
    %12 = vector.shape_cast %11 : vector<256xf32> to vector<1x256xf32>
    %13 = tpu.reciprocal %12 {approx = true} : vector<1x256xf32> -> vector<1x256xf32>
    %14 = vector.broadcast %13 : vector<1x256xf32> to vector<30x256xf32>
    %15 = arith.mulf %10, %14 : vector<30x256xf32>
    %c0_7 = arith.constant 0 : index
    %c0_8 = arith.constant 0 : index
    %16 = vector.load %arg4[%c0_7, %c0_8] : memref<30x30xf32, #tpu.memory_space<vmem>>, vector<30x30xf32>
    %cst_9 = arith.constant dense<0.000000e+00> : vector<30x256xf32>
    %17 = tpu.matmul %16, %15, %cst_9 {dimension_numbers = #tpu.dot_dimension_numbers<[1], [0], [0], [1], [0, 0, 1, 1], [], []>} : vector<30x30xf32>, vector<30x256xf32>, vector<30x256xf32> -> vector<30x256xf32>
    %c0_10 = arith.constant 0 : index
    %c0_11 = arith.constant 0 : index
    %18 = vector.load %arg5[%c0_10, %c0_11] : memref<30x1xf32, #tpu.memory_space<vmem>>, vector<30x1xf32>
    %19 = vector.broadcast %18 : vector<30x1xf32> to vector<30x256xf32>
    %20 = arith.addf %17, %19 : vector<30x256xf32>
    %cst_12 = arith.constant dense<0xFF800000> : vector<256xf32>
    %21 = vector.multi_reduction <maximumf>, %20, %cst_12 [0] : vector<30x256xf32> to vector<256xf32>
    %22 = vector.shape_cast %21 : vector<256xf32> to vector<1x256xf32>
    %23 = vector.broadcast %22 : vector<1x256xf32> to vector<30x256xf32>
    %24 = arith.subf %20, %23 : vector<30x256xf32>
    %25 = math.exp %24 : vector<30x256xf32>
    %cst_13 = arith.constant dense<0.000000e+00> : vector<256xf32>
    %26 = vector.multi_reduction <add>, %25, %cst_13 [0] : vector<30x256xf32> to vector<256xf32>
    %27 = vector.shape_cast %26 : vector<256xf32> to vector<1x256xf32>
    %28 = tpu.reciprocal %27 {approx = true} : vector<1x256xf32> -> vector<1x256xf32>
    %29 = vector.broadcast %28 : vector<1x256xf32> to vector<30x256xf32>
    %30 = arith.mulf %25, %29 : vector<30x256xf32>
    %c0_14 = arith.constant 0 : index
    %c0_15 = arith.constant 0 : index
    %31 = vector.load %arg6[%c0_14, %c0_15] : memref<4x30xf32, #tpu.memory_space<vmem>>, vector<4x30xf32>
    %cst_16 = arith.constant dense<0.000000e+00> : vector<4x256xf32>
    %32 = tpu.matmul %31, %30, %cst_16 {dimension_numbers = #tpu.dot_dimension_numbers<[1], [0], [0], [1], [0, 0, 1, 1], [], []>} : vector<4x30xf32>, vector<30x256xf32>, vector<4x256xf32> -> vector<4x256xf32>
    %c0_17 = arith.constant 0 : index
    %c0_18 = arith.constant 0 : index
    %33 = vector.load %arg7[%c0_17, %c0_18] : memref<4x1xf32, #tpu.memory_space<vmem>>, vector<4x1xf32>
    %34 = vector.broadcast %33 : vector<4x1xf32> to vector<4x256xf32>
    %35 = arith.addf %32, %34 : vector<4x256xf32>
    %cst_19 = arith.constant dense<0xFF800000> : vector<256xf32>
    %36 = vector.multi_reduction <maximumf>, %35, %cst_19 [0] : vector<4x256xf32> to vector<256xf32>
    %37 = vector.shape_cast %36 : vector<256xf32> to vector<1x256xf32>
    %38 = vector.broadcast %37 : vector<1x256xf32> to vector<4x256xf32>
    %39 = arith.subf %35, %38 : vector<4x256xf32>
    %40 = math.exp %39 : vector<4x256xf32>
    %cst_20 = arith.constant dense<0.000000e+00> : vector<256xf32>
    %41 = vector.multi_reduction <add>, %40, %cst_20 [0] : vector<4x256xf32> to vector<256xf32>
    %42 = vector.shape_cast %41 : vector<256xf32> to vector<1x256xf32>
    %43 = vector.broadcast %42 : vector<1x256xf32> to vector<4x256xf32>
    %44 = arith.divf %40, %43 : vector<4x256xf32>
    %c0_21 = arith.constant 0 : index
    %c0_22 = arith.constant 0 : index
    %45 = vector.load %arg8[%c0_21, %c0_22] : memref<4x256xf32, #tpu.memory_space<vmem>>, vector<4x256xf32>
    tpu.vector_store %arg8[%c0_21, %c0_22], %44 {strides = array<i32>} : memref<4x256xf32, #tpu.memory_space<vmem>>, vector<4x256xf32>,
    return
  }
  func.func @transform_0(%arg0: i32) -> (i32, i32) {
    %c0_i32 = arith.constant 0 : i32
    %c0_i32_0 = arith.constant 0 : i32
    return %c0_i32, %arg0 : i32, i32
  }
  func.func @transform_1(%arg0: i32) -> (i32, i32) {
    %c0_i32 = arith.constant 0 : i32
    %c0_i32_0 = arith.constant 0 : i32
    %c0_i32_1 = arith.constant 0 : i32
    return %c0_i32, %c0_i32_0 : i32, i32
  }
  func.func @transform_2(%arg0: i32) -> (i32, i32) {
    %c0_i32 = arith.constant 0 : i32
    %c0_i32_0 = arith.constant 0 : i32
    %c0_i32_1 = arith.constant 0 : i32
    return %c0_i32, %c0_i32_0 : i32, i32
  }
  func.func @transform_3(%arg0: i32) -> (i32, i32) {
    %c0_i32 = arith.constant 0 : i32
    %c0_i32_0 = arith.constant 0 : i32
    %c0_i32_1 = arith.constant 0 : i32
    return %c0_i32, %c0_i32_0 : i32, i32
  }
  func.func @transform_4(%arg0: i32) -> (i32, i32) {
    %c0_i32 = arith.constant 0 : i32
    %c0_i32_0 = arith.constant 0 : i32
    %c0_i32_1 = arith.constant 0 : i32
    return %c0_i32, %c0_i32_0 : i32, i32
  }
  func.func @transform_5(%arg0: i32) -> (i32, i32) {
    %c0_i32 = arith.constant 0 : i32
    %c0_i32_0 = arith.constant 0 : i32
    %c0_i32_1 = arith.constant 0 : i32
    return %c0_i32, %c0_i32_0 : i32, i32
  }
  func.func @transform_6(%arg0: i32) -> (i32, i32) {
    %c0_i32 = arith.constant 0 : i32
    %c0_i32_0 = arith.constant 0 : i32
    %c0_i32_1 = arith.constant 0 : i32
    return %c0_i32, %c0_i32_0 : i32, i32
  }
  func.func @transform_7(%arg0: i32) -> (i32, i32) {
    %c0_i32 = arith.constant 0 : i32
    %c0_i32_0 = arith.constant 0 : i32
    return %c0_i32, %arg0 : i32, i32
  }
}

</mosaic_0001>

<bundles_post_ra>
// kernel: tpu_custom_call.1
= control target key start
LH: loop header
LB: loop body
LE: loop exit
PB: predicated region body
PF: predicated region fallthrough
CT: control target
= control target key end

     0   :  { %12 = vsyncpa [#allocation4], 0  ;;  %s1298_s0 = inlined_call_operand.vmem [shape: f32[10,512], index: 0, kind: input, shape index: {}]   ;;  %s1299_s1 = inlined_call_operand.vmem [shape: f32[30,10], index: 1, kind: input, shape index: {}]   ;;  %s1300_s2 = inlined_call_operand.vmem [shape: f32[30,1], index: 2, kind: input, shape index: {}]   ;;  %s1301_s3 = inlined_call_operand.vmem [shape: f32[30,30], index: 3, kind: input, shape index: {}]   ;;  %s1302_s4 = inlined_call_operand.vmem [shape: f32[30,1], index: 4, kind: input, shape index: {}]   ;;  %s1303_s5 = inlined_call_operand.vmem [shape: f32[4,30], index: 5, kind: input, shape index: {}]   ;;  %s1304_s6 = inlined_call_operand.vmem [shape: f32[4,1], index: 6, kind: input, shape index: {}]   ;;  %s1305_s7 = inlined_call_operand.hbm [shape: f32[4,512], index: 7, kind: output, shape index: {}]  }
   0x1   :  { %14 = vsyncpa [#allocation4 + $0x1], 0  ;;  %s1114_s24 = smov 0   ;;  %s1116_s25 = smov 0  }
   0x2   :  { %s1118_s26 = smov 0   ;;  %s1120_s27 = smov 0  }
   0x3 LB: > { %s877_s28 = sadd.s32 4294967295, %s1071_s27   ;;  %s878_s29 = sadd.s32 4294967294, %s1071_s27   ;;  %s1071_s27 = sphi %s1120_s27, %s1311_s27   ;;  %s1067_s26 = sphi %s1118_s26, %s1310_s26   ;;  %s1063_s25 = sphi %s1116_s25, %s1309_s25   ;;  %s1059_s24 = sphi %s1114_s24, %s1308_s24  }
   0x4   : > { %s1137_s30 = sadd.s32 1, %s1071_s27   ;;  %s27_s8 = sadd.s32 1, %s1067_s26 }
   0x5   : > { %s24_s9 = ssub.s32 %s1071_s27, %s1137_s30  ;;  %p34_p0 = scmp.ne.s32.totalorder %s1067_s26, %s1063_s25 }
   0x6   : > { %p25_p1 = scmp.eq.s32.totalorder %s24_s9, 0  ;;  %p35_p2 = scmp.eq.s32.totalorder %s1071_s27, 0 }
   0x7   : > { %p190_p3 = scmp.eq.s32.totalorder %s877_s28, 1  ;;  %p195_p4 = scmp.ne.s32.totalorder %s1063_s25, %s1059_s24 }
   0x8   : > { %s1150_s10 = scalar_select %p25_p1, %s1067_s26, %s27_s8  }
   0x9   : > { %p36_p5 = por %p35_p2, %p34_p0  ;;  %p1152_p6 = por %p190_p3, %p34_p0 }
   0xa   : > { %p196_p7 = scmp.eq.s32.totalorder %s878_s29, 1  ;;  %p880_p9 = scmp.ge.s32.totalorder %s1071_s27, 2 }
   0xc   : > { %p1156_p8 = por %p196_p7, %p195_p4  ;;  %230 = sbr.rel (%p880_p9) target bundleno = 25 (0x19), region = 40 }
  0x11   : > { %233 = sbr.rel (!%p36_p5) target bundleno = 25 (0x19), region = 44  ;;  %s235_s13 = sand.u32 (%p36_p5), 1, %s1067_s26  }
  0x12   : > { %s916_s14 = sshll.u32 (%p36_p5), %s1071_s27, 4  ;;  %s881_s15 = sshll.u32 (%p36_p5), %s235_s13, 5 }
  0x13   : > { %s240_s18 = scalar_lea.vmem (%p36_p5), %s1298_s0, %s916_s14  ;;  %s237_s19 = scalar_lea.vmem (%p36_p5), [#allocation2], %s881_s15 }
  0x14   : > { %v253_v0 = vld [vmem:[%s240_s18] sm:$0xff] (%p36_p5)  ;;  %v255_v1 = vld [vmem:[%s240_s18 + $0x8] sm:$0xff] (%p36_p5) }
  0x15   : > { %v257_v2 = vld [vmem:[%s240_s18 + $0x20] sm:$0xff] (%p36_p5)  ;;  %254 = vst [vmem:[%s237_s19] sm:$0xff] (%p36_p5), %v253_v0  ;;  %v259_v3 = vld [vmem:[%s240_s18 + $0x28] sm:$0xff] (%p36_p5) }
  0x16   : > { %256 = vst [vmem:[%s237_s19 + $0x8] sm:$0xff] %v255_v1 }
  0x17   : > { %258 = vst [vmem:[%s237_s19 + $0x10] sm:$0xff] %v257_v2 }
  0x18   : > { %260 = vst [vmem:[%s237_s19 + $0x18] sm:$0xff] %v259_v3 }
  0x19 PF: > { %p884_p10 = scmp.ge.s32.totalorder %s1071_s27, 1  ;;  %p265_p11 = scmp.lt.s32.totalorder %s1071_s27, 3 }
  0x1b   : > { %p266_p12 = pnand %p884_p10, %p265_p11 }
  0x1c   : > { %s1171_s20 = sand.u32 (!%p266_p12), 1, %s1063_s25   ;;  %s1029_s18 = scalar_lea.hbm (!%p266_p12), %s1305_s7, 16 }
  0x1d   : > { %269 = sbr.rel (%p266_p12) target bundleno = 671 (0x29f), region = 67  ;;  %s885_s21 = sshll.u32 (!%p266_p12), %s1171_s20, 5 }
  0x1e   : > { %s274_s9 = scalar_lea.vmem (!%p266_p12), [#allocation2], %s885_s21  ;;  %s886_s19 = sshll.u32 (!%p266_p12), %s1171_s20, 3 }
  0x1f   : > { %s917_s21 = sshll.u32 (!%p266_p12), %s877_s28, 3  ;;  %s302_s28 = scalar_lea.vmem (!%p266_p12), [#allocation3], %s886_s19 }
  0x20   : > { %s808_s29 = scalar_lea.hbm (!%p266_p12), %s1305_s7, %s917_s21  ;;  %s810_s8 = sshll.u32 (!%p266_p12), %s302_s28, 4  ;;  %s811_s8 = int_to_ptr.vmem [resolvable:$true] %s810_s8 }
  0x21   : > { %s797_s13 = scalar_lea.sflag (!%p266_p12), [#allocation4], %s1171_s20 }
  0x22   : > { %vm350_vm0 = vcmask 1041408   ;;  %v1073_v4 = vmov 0   ;;  %v316_v5 = vld [vmem:[%s1300_s2 + $0x18] sm:$0x3f]  ;;  %v314_v6 = vld [vmem:[%s1300_s2 + $0x8] sm:$0xff]  ;;  %v305_v9 = vld [vmem:[%s274_s9] sm:$0xff] }
  0x23   : > { %958 = vset.pattern.permute.xlu0 %v1073_v4  ;;  %959 = vset.pattern.permute.xlu1 %v1073_v4  ;;  %v307_v7 = vld [vmem:[%s274_s9 + $0x10] sm:$0x3]  ;;  %v308_v8 = vld [vmem:[%s274_s9 + $0x18] sm:$0x3]  ;;  %v306_v10 = vld [vmem:[%s274_s9 + $0x8] sm:$0xff]  ;;  %vm337_vm1 = vcmask 80896  }
  0x24   : > { %334 = vperm.xlu0 %958, %v316_v5   ;;  %324 = vperm.xlu1 %959, %v314_v6   ;;  %v309_v11 = vld [vmem:[%s1299_s1] sm:$0xff]  ;;  %v315_v13 = vld [vmem:[%s1300_s2 + $0x10] sm:$0xff]  ;;  %v310_v14 = vld [vmem:[%s1299_s1 + $0x8] sm:$0xff]  ;;  %vm416_vm2 = vcmask 1045504   ;;  %vm518_vm3 = vcmask 244736   ;;  %vm725_vm4 = vcmask 1043456  }
  0x25   : > { %960 = vset.pattern.permute.xlu2 %v1073_v4  ;;  %887 = vmatpush.msk.msra.mxu0 %vm350_vm0, %v307_v7  ;;  %v313_v12 = vld [vmem:[%s1300_s2] sm:$0xff]  ;;  %v496_v15 = vld [vmem:[%s1302_s4 + $0x10] sm:$0xff]  ;;  %v495_v16 = vld [vmem:[%s1302_s4 + $0x8] sm:$0xff]  ;;  %s812_s9 = sshll.u32 %s808_s29, 4  ;;  %s813_s9 = int_to_ptr.hbm [resolvable:$true] %s812_s9 }
  0x26   : > { %892 = vmatpush.msk.msra.mxu1 %vm350_vm0, %v308_v8  ;;  %v311_v17 = vld [vmem:[%s1299_s1 + $0x10] sm:$0xff]  ;;  %v312_v18 = vld [vmem:[%s1299_s1 + $0x18] sm:$0x3f]  ;;  %s1023_s14 = sshra.s32 %s813_s9, 4  ;;  %s1024_s14 = int_to_ptr.hbm [resolvable:$true] %s1023_s14 }
  0x27   : > { %372 = vmatpush.msra.mxu0 %v305_v9  ;;  %s1025_s15 = scalar_lea.hbm %s1024_s14, 8  ;;  %p1030_p2 = scmp.lt.s32.totalorder %s1024_s14, %s1305_s7 }
  0x28   : > { %401 = vmatpush.msra.mxu1 %v306_v10  ;;  %888 = vmatmul.msk.f32.vlgmr.msra.gmra.mxu0 %vm337_vm1, %v309_v11  ;;  %p1026_p13 = scmp.ne.s32.totalorder %s1024_s14, %s1025_s15  ;;  %p1031_p3 = scmp.lt.s32.totalorder %s1029_s18, %s1025_s15 }
  0x29   : > { %893 = vmatmul.msk.f32.vlgmr.msra.gmra.mxu1 %vm337_vm1, %v309_v11 }
  0x2a   : > { %p1027_p0 = pnand %p1026_p13, %p1152_p6  ;;  %p1032_p4 = por %p1031_p3, %p1030_p2 }
  0x2c   : > { %319 = vperm.xlu0 %958, %v313_v12   ;;  %329 = vperm.xlu1 %959, %v315_v13   ;;  %p1028_p1 = pneg %p1027_p0 }
  0x2e   : > { %p1033_p5 = pnand %p1032_p4, %p1028_p1 }
  0x30   : > { %889 = vmatmul.msk.f32.gmra.mxu0 %vm337_vm1, %v310_v14 }
  0x31   : > { %894 = vmatmul.msk.f32.gmra.mxu1 %vm337_vm1, %v310_v14 }
  0x34   : > { %510 = vperm.xlu1 %959, %v496_v15   ;;  %505 = vperm.xlu0 %958, %v495_v16  }
  0x38   : > { %890 = vmatmul.msk.f32.gmra.mxu0 %vm337_vm1, %v311_v17 }
  0x39   : > { %895 = vmatmul.msk.f32.gmra.mxu1 %vm337_vm1, %v311_v17 }
  0x40   : > { %891 = vmatmul.msk.f32.gmra.mxu0 %vm337_vm1, %v312_v18 }
  0x41   : > { %896 = vmatmul.msk.f32.gmra.mxu1 %vm337_vm1, %v312_v18 }
  0x96   : > { %v335_v23 = vpop.permute.xlu0 %334  ;;  %v325_v24 = vpop.permute.xlu1 %324 }
  0x9e   : > { %v320_v27 = vpop.permute.xlu0 %319  ;;  %v330_v28 = vpop.permute.xlu1 %329 }
  0xa5   : > { %v374_v19 = vpop.f32.mrf.mxu0 }
  0xa6   : > { %v403_v20 = vpop.f32.mrf.mxu1  ;;  %v375_v35 = vadd.f32 %v374_v19, %v320_v27 }
  0xa7   : > { %v404_v36 = vadd.f32 %v403_v20, %v320_v27 }
  0xad   : > { %v377_v21 = vpop.f32.mrf.mxu0 }
  0xae   : > { %v406_v22 = vpop.f32.mrf.mxu1  ;;  %v378_v37 = vadd.f32 %v377_v21, %v325_v24 }
  0xaf   : > { %v407_v38 = vadd.f32 %v406_v22, %v325_v24 }
  0xb5   : > { %v380_v25 = vpop.f32.mrf.mxu0 }
  0xb6   : > { %v409_v26 = vpop.f32.mrf.mxu1  ;;  %v381_v29 = vadd.f32 %v380_v25, %v330_v28 }
  0xb7   : > { %v410_v30 = vadd.f32 %v409_v26, %v330_v28 }
  0xb8   : > { %v415_v41 = vmax.f32 %v375_v35, %v381_v29 }
  0xb9   : > { %v426_v42 = vmax.f32 %v404_v36, %v410_v30 }
  0xbd   : > { %v383_v31 = vpop.f32.mrf.mxu0 }
  0xbe   : > { %v412_v32 = vpop.f32.mrf.mxu1  ;;  %v384_v33 = vadd.f32 %v383_v31, %v335_v23 }
  0xbf   : > { %v413_v34 = vadd.f32 %v412_v32, %v335_v23 }
  0xc0   : > { %v417_v39 = vsel %vm416_vm2, %v384_v33, -inf }
  0xc1   : > { %v427_v40 = vsel %vm416_vm2, %v413_v34, -inf  ;;  %v418_v43 = vmax.f32 %v378_v37, %v417_v39 }
  0xc2   : > { %v428_v44 = vmax.f32 %v407_v38, %v427_v40 }
  0xc3   : > { %v419_v45 = vmax.f32 %v415_v41, %v418_v43 }
  0xc4   : > { %v429_v46 = vmax.f32 %v426_v42, %v428_v44 }
  0xc5   : > { %v420_v47 = vrot.slane %v419_v45, 4 }
  0xc6   : > { %v430_v48 = vrot.slane %v429_v46, 4 }
  0xc7   : > { %v421_v49 = vmax.f32 %v419_v45, %v420_v47  ;;  %v497_v45 = vld [vmem:[%s1302_s4 + $0x18] sm:$0x3f] }
  0xc8   : > { %v431_v50 = vmax.f32 %v429_v46, %v430_v48  ;;  %v490_v48 = vld [vmem:[%s1301_s3] sm:$0xff]  ;;  %515 = vperm.xlu2 %960, %v497_v45  }
  0xc9   : > { %v422_v51 = vrot.slane %v421_v49, 2 }
  0xca   : > { %v432_v52 = vrot.slane %v431_v50, 2 }
  0xcb   : > { %v423_v53 = vmax.f32 %v421_v49, %v422_v51  ;;  %v494_v51 = vld [vmem:[%s1302_s4] sm:$0xff] }
  0xcc   : > { %v433_v54 = vmax.f32 %v431_v50, %v432_v52  ;;  %v491_v52 = vld [vmem:[%s1301_s3 + $0x8] sm:$0xff] }
  0xcd   : > { %v424_v55 = vrot.slane %v423_v53, 1 }
  0xce   : > { %v434_v56 = vrot.slane %v433_v54, 1 }
  0xcf   : > { %v425_v57 = vmax.f32 %v423_v53, %v424_v55  ;;  %v670_v53 = vld [vmem:[%s1304_s6] sm:$0xf]  ;;  %v493_v55 = vld [vmem:[%s1301_s3 + $0x18] sm:$0x3f] }
  0xd0   : > { %v435_v58 = vmax.f32 %v433_v54, %v434_v56  ;;  %500 = vperm.xlu2 %960, %v494_v51   ;;  %v492_v54 = vld [vmem:[%s1301_s3 + $0x10] sm:$0xff] }
  0xd1   : > { %v436_v59 = vsub.f32 %v375_v35, %v425_v57  ;;  %v438_v60 = vsub.f32 %v378_v37, %v425_v57  ;;  %v440_v61 = vsub.f32 %v381_v29, %v425_v57  ;;  %v442_v62 = vsub.f32 %v384_v33, %v425_v57 }
  0xd2   : > { %v437_v63 = vsub.f32 %v404_v36, %v435_v58  ;;  %v439_v0 = vsub.f32 %v407_v38, %v435_v58  ;;  %v441_v4 = vsub.f32 %v410_v30, %v435_v58  ;;  %v443_v6 = vsub.f32 %v413_v34, %v435_v58 }
  0xd3   : > { %v444_v1 = vmul.f32 1.442695, %v436_v59  ;;  %v448_v2 = vmul.f32 1.442695, %v438_v60  ;;  %v452_v3 = vmul.f32 1.442695, %v440_v61 }
  0xd4   : > { %v456_v5 = vmul.f32 1.442695, %v442_v62  ;;  %v446_v7 = vmul.f32 1.442695, %v437_v63  ;;  %v450_v8 = vmul.f32 1.442695, %v439_v0  ;;  %v511_v63 = vpop.permute.xlu1 %510 }
  0xd5   : > { %961 = vpow2.f32 %v444_v1  ;;  %v454_v9 = vmul.f32 1.442695, %v441_v4  ;;  %v458_v10 = vmul.f32 1.442695, %v443_v6 }
  0xd6   : > { %963 = vpow2.f32 %v448_v2  ;;  %v506_v2 = vpop.permute.xlu0 %505 }
  0xd7   : > { %965 = vpow2.f32 %v452_v3 }
  0xd8   : > { %967 = vpow2.f32 %v456_v5  ;;  %673 = vperm.xlu2 %960, %v670_v53  }
  0xd9   : > { %969 = vpow2.f32 %v446_v7 }
  0xda   : > { %971 = vpow2.f32 %v450_v8 }
  0xdb   : > { %v962_v11 = vpop.eup %961  ;;  %973 = vpow2.f32 %v454_v9 }
  0xdc   : > { %v964_v12 = vpop.eup %963  ;;  %975 = vpow2.f32 %v458_v10 }
  0xdd   : > { %v966_v13 = vpop.eup %965  ;;  %v460_v14 = vadd.f32 %v964_v12, %v962_v11 }
  0xde   : > { %v968_v15 = vpop.eup %967 }
  0xdf   : > { %v970_v16 = vpop.eup %969  ;;  %v461_v17 = vadd.f32 %v966_v13, %v460_v14  ;;  %v462_v19 = vsel %vm416_vm2, %v968_v15, 0.0 }
  0xe0   : > { %v972_v18 = vpop.eup %971 }
  0xe1   : > { %v974_v20 = vpop.eup %973  ;;  %v463_v21 = vadd.f32 %v462_v19, %v461_v17  ;;  %v470_v22 = vadd.f32 %v972_v18, %v970_v16 }
  0xe2   : > { %v976_v23 = vpop.eup %975 }
  0xe3   : > { %v464_v24 = vrot.slane %v463_v21, 4  ;;  %v471_v25 = vadd.f32 %v974_v20, %v470_v22  ;;  %v472_v26 = vsel %vm416_vm2, %v976_v23, 0.0 }
  0xe5   : > { %v465_v27 = vadd.f32 %v464_v24, %v463_v21  ;;  %v473_v28 = vadd.f32 %v472_v26, %v471_v25 }
  0xe7   : > { %v466_v29 = vrot.slane %v465_v27, 2  ;;  %v474_v30 = vrot.slane %v473_v28, 4 }
  0xe9   : > { %v467_v31 = vadd.f32 %v466_v29, %v465_v27  ;;  %v475_v32 = vadd.f32 %v474_v30, %v473_v28 }
  0xeb   : > { %v468_v33 = vrot.slane %v467_v31, 1  ;;  %v476_v34 = vrot.slane %v475_v32, 2 }
  0xed   : > { %v469_v35 = vadd.f32 %v468_v33, %v467_v31  ;;  %v477_v36 = vadd.f32 %v476_v34, %v475_v32 }
  0xef   : > { %977 = vrcp.f32 %v469_v35  ;;  %v478_v37 = vrot.slane %v477_v36, 1 }
  0xf1   : > { %v479_v38 = vadd.f32 %v478_v37, %v477_v36 }
  0xf3   : > { %979 = vrcp.f32 %v479_v38 }
  0xf5   : > { %v978_v39 = vpop.eup %977 }
  0xf6   : > { %v488_v40 = vmul.f32 %v978_v39, %v968_v15  ;;  %v486_v41 = vmul.f32 %v978_v39, %v966_v13  ;;  %v484_v44 = vmul.f32 %v978_v39, %v964_v12  ;;  %v482_v47 = vmul.f32 %v978_v39, %v962_v11 }
  0xf8   : > { %897 = vmatpush.msk.msra.mxu2 %vm416_vm2, %v488_v40 }
  0xf9   : > { %v980_v42 = vpop.eup %979 }
  0xfa   : > { %v489_v43 = vmul.f32 %v980_v42, %v976_v23  ;;  %550 = vmatpush.msra.mxu2 %v486_v41  ;;  %v487_v46 = vmul.f32 %v980_v42, %v974_v20  ;;  %v485_v49 = vmul.f32 %v980_v42, %v972_v18  ;;  %v483_v50 = vmul.f32 %v980_v42, %v970_v16 }
  0xfc   : > { %902 = vmatpush.msk.msra.mxu3 %vm416_vm2, %v489_v43  ;;  %551 = vmatpush.msra.mxu2 %v484_v44 }
  0xfe   : > { %579 = vmatpush.msra.mxu3 %v487_v46  ;;  %552 = vmatpush.msra.mxu2 %v482_v47 }
  0xff   : > { %898 = vmatmul.msk.f32.vlgmr.msra.gmra.mxu2 %vm518_vm3, %v490_v48 }
 0x100   : > { %580 = vmatpush.msra.mxu3 %v485_v49 }
 0x102   : > { %581 = vmatpush.msra.mxu3 %v483_v50 }
 0x103   : > { %903 = vmatmul.msk.f32.vlgmr.msra.gmra.mxu3 %vm518_vm3, %v490_v48 }
 0x107   : > { %899 = vmatmul.msk.f32.gmra.mxu2 %vm518_vm3, %v491_v52 }
 0x10b   : > { %904 = vmatmul.msk.f32.gmra.mxu3 %vm518_vm3, %v491_v52 }
 0x10f   : > { %900 = vmatmul.msk.f32.gmra.mxu2 %vm518_vm3, %v492_v54 }
 0x113   : > { %905 = vmatmul.msk.f32.gmra.mxu3 %vm518_vm3, %v492_v54 }
 0x117   : > { %901 = vmatmul.msk.f32.gmra.mxu2 %vm518_vm3, %v493_v55 }
 0x11b   : > { %906 = vmatmul.msk.f32.gmra.mxu3 %vm518_vm3, %v493_v55 }
 0x122   : > { %v516_v60 = vpop.permute.xlu2 %515 }
 0x12a   : > { %v501_v3 = vpop.permute.xlu2 %500 }
 0x182   : > { %v554_v56 = vpop.f32.mrf.mxu2 }
 0x183   : > { %v555_v5 = vadd.f32 %v554_v56, %v501_v3 }
 0x186   : > { %v583_v57 = vpop.f32.mrf.mxu3 }
 0x187   : > { %v584_v13 = vadd.f32 %v583_v57, %v501_v3 }
 0x18a   : > { %v557_v58 = vpop.f32.mrf.mxu2 }
 0x18b   : > { %v558_v6 = vadd.f32 %v557_v58, %v506_v2 }
 0x18e   : > { %v586_v59 = vpop.f32.mrf.mxu3 }
 0x18f   : > { %v587_v14 = vadd.f32 %v586_v59, %v506_v2 }
 0x192   : > { %v560_v61 = vpop.f32.mrf.mxu2 }
 0x193   : > { %v561_v0 = vadd.f32 %v560_v61, %v511_v63 }
 0x195   : > { %v595_v8 = vmax.f32 %v555_v5, %v561_v0 }
 0x196   : > { %v589_v62 = vpop.f32.mrf.mxu3 }
 0x197   : > { %v590_v9 = vadd.f32 %v589_v62, %v511_v63 }
 0x199   : > { %v605_v17 = vmax.f32 %v584_v13, %v590_v9 }
 0x19a   : > { %v563_v1 = vpop.f32.mrf.mxu2 }
 0x19b   : > { %v564_v4 = vadd.f32 %v563_v1, %v516_v60 }
 0x19d   : > { %v596_v7 = vsel %vm416_vm2, %v564_v4, -inf }
 0x19e   : > { %v597_v10 = vmax.f32 %v558_v6, %v596_v7  ;;  %v592_v11 = vpop.f32.mrf.mxu3 }
 0x19f   : > { %v593_v12 = vadd.f32 %v592_v11, %v516_v60 }
 0x1a0   : > { %v598_v15 = vmax.f32 %v595_v8, %v597_v10 }
 0x1a1   : > { %v606_v16 = vsel %vm416_vm2, %v593_v12, -inf }
 0x1a2   : > { %v599_v18 = vrot.slane %v598_v15, 4  ;;  %v607_v19 = vmax.f32 %v587_v14, %v606_v16 }
 0x1a4   : > { %v600_v20 = vmax.f32 %v598_v15, %v599_v18  ;;  %v608_v21 = vmax.f32 %v605_v17, %v607_v19  ;;  %v669_v19 = vld [vmem:[%s1303_s5] sm:$0xf] }
 0x1a6   : > { %v601_v22 = vrot.slane %v600_v20, 2  ;;  %v609_v23 = vrot.slane %v608_v21, 4 }
 0x1a8   : > { %v602_v24 = vmax.f32 %v600_v20, %v601_v22  ;;  %v610_v25 = vmax.f32 %v608_v21, %v609_v23  ;;  %v674_v23 = vpop.permute.xlu2 %673 }
 0x1aa   : > { %v603_v26 = vrot.slane %v602_v24, 1  ;;  %v611_v27 = vrot.slane %v610_v25, 2 }
 0x1ac   : > { %v604_v28 = vmax.f32 %v602_v24, %v603_v26  ;;  %v612_v29 = vmax.f32 %v610_v25, %v611_v27 }
 0x1ae   : > { %v615_v30 = vsub.f32 %v555_v5, %v604_v28  ;;  %v617_v31 = vsub.f32 %v558_v6, %v604_v28  ;;  %v619_v32 = vsub.f32 %v561_v0, %v604_v28  ;;  %v621_v33 = vsub.f32 %v564_v4, %v604_v28 }
 0x1af   : > { %v613_v34 = vrot.slane %v612_v29, 1 }
 0x1b0   : > { %v623_v35 = vmul.f32 1.442695, %v615_v30  ;;  %v627_v36 = vmul.f32 1.442695, %v617_v31  ;;  %v631_v37 = vmul.f32 1.442695, %v619_v32 }
 0x1b1   : > { %v635_v38 = vmul.f32 1.442695, %v621_v33  ;;  %v614_v39 = vmax.f32 %v612_v29, %v613_v34 }
 0x1b2   : > { %981 = vpow2.f32 %v623_v35 }
 0x1b3   : > { %983 = vpow2.f32 %v627_v36  ;;  %v616_v40 = vsub.f32 %v584_v13, %v614_v39  ;;  %v618_v41 = vsub.f32 %v587_v14, %v614_v39  ;;  %v620_v42 = vsub.f32 %v590_v9, %v614_v39 }
 0x1b4   : > { %985 = vpow2.f32 %v631_v37  ;;  %v622_v43 = vsub.f32 %v593_v12, %v614_v39 }
 0x1b5   : > { %987 = vpow2.f32 %v635_v38  ;;  %v625_v44 = vmul.f32 1.442695, %v616_v40  ;;  %v629_v45 = vmul.f32 1.442695, %v618_v41  ;;  %v633_v46 = vmul.f32 1.442695, %v620_v42 }
 0x1b6   : > { %v637_v47 = vmul.f32 1.442695, %v622_v43 }
 0x1b7   : > { %989 = vpow2.f32 %v625_v44 }
 0x1b8   : > { %v982_v48 = vpop.eup %981  ;;  %991 = vpow2.f32 %v629_v45 }
 0x1b9   : > { %v984_v49 = vpop.eup %983  ;;  %993 = vpow2.f32 %v633_v46 }
 0x1ba   : > { %v986_v50 = vpop.eup %985  ;;  %v639_v51 = vadd.f32 %v984_v49, %v982_v48  ;;  %995 = vpow2.f32 %v637_v47 }
 0x1bb   : > { %v988_v52 = vpop.eup %987 }
 0x1bc   : > { %v640_v53 = vadd.f32 %v986_v50, %v639_v51  ;;  %v641_v55 = vsel %vm416_vm2, %v988_v52, 0.0 }
 0x1bd   : > { %v990_v54 = vpop.eup %989 }
 0x1be   : > { %v992_v56 = vpop.eup %991  ;;  %v642_v57 = vadd.f32 %v641_v55, %v640_v53 }
 0x1bf   : > { %v994_v58 = vpop.eup %993  ;;  %v649_v59 = vadd.f32 %v992_v56, %v990_v54 }
 0x1c0   : > { %v996_v60 = vpop.eup %995  ;;  %v643_v61 = vrot.slane %v642_v57, 4 }
 0x1c1   : > { %v650_v62 = vadd.f32 %v994_v58, %v649_v59  ;;  %v651_v0 = vsel %vm416_vm2, %v996_v60, 0.0 }
 0x1c2   : > { %v644_v63 = vadd.f32 %v643_v61, %v642_v57 }
 0x1c3   : > { %v652_v1 = vadd.f32 %v651_v0, %v650_v62 }
 0x1c4   : > { %v645_v2 = vrot.slane %v644_v63, 2 }
 0x1c5   : > { %v653_v3 = vrot.slane %v652_v1, 4 }
 0x1c6   : > { %v646_v4 = vadd.f32 %v645_v2, %v644_v63 }
 0x1c7   : > { %v654_v5 = vadd.f32 %v653_v3, %v652_v1 }
 0x1c8   : > { %v647_v6 = vrot.slane %v646_v4, 1 }
 0x1c9   : > { %v655_v7 = vrot.slane %v654_v5, 2 }
 0x1ca   : > { %v648_v8 = vadd.f32 %v647_v6, %v646_v4 }
 0x1cb   : > { %v656_v9 = vadd.f32 %v655_v7, %v654_v5 }
 0x1cc   : > { %997 = vrcp.f32 %v648_v8 }
 0x1cd   : > { %v657_v10 = vrot.slane %v656_v9, 1 }
 0x1cf   : > { %v658_v11 = vadd.f32 %v657_v10, %v656_v9 }
 0x1d1   : > { %999 = vrcp.f32 %v658_v11 }
 0x1d2   : > { %v998_v12 = vpop.eup %997 }
 0x1d3   : > { %v667_v13 = vmul.f32 %v998_v12, %v988_v52  ;;  %v665_v14 = vmul.f32 %v998_v12, %v986_v50  ;;  %v663_v16 = vmul.f32 %v998_v12, %v984_v49  ;;  %v661_v18 = vmul.f32 %v998_v12, %v982_v48 }
 0x1d5   : > { %907 = vmatpush.msk.msrb.mxu0 %vm416_vm2, %v667_v13 }
 0x1d7   : > { %v1000_v15 = vpop.eup %999  ;;  %698 = vmatpush.msrb.mxu0 %v665_v14 }
 0x1d8   : > { %v668_v17 = vmul.f32 %v1000_v15, %v996_v60  ;;  %v666_v20 = vmul.f32 %v1000_v15, %v994_v58  ;;  %v664_v21 = vmul.f32 %v1000_v15, %v992_v56  ;;  %v662_v22 = vmul.f32 %v1000_v15, %v990_v54 }
 0x1d9   : > { %699 = vmatpush.msrb.mxu0 %v663_v16 }
 0x1da   : > { %909 = vmatpush.msk.msrb.mxu1 %vm416_vm2, %v668_v17 }
 0x1db   : > { %700 = vmatpush.msrb.mxu0 %v661_v18 }
 0x1dc   : > { %718 = vmatpush.msrb.mxu1 %v666_v20  ;;  %908 = vmatmul.msk.f32.vlgmr.msrb.gmra.mxu0 %vm518_vm3, %v669_v19 }
 0x1de   : > { %719 = vmatpush.msrb.mxu1 %v664_v21 }
 0x1e0   : > { %720 = vmatpush.msrb.mxu1 %v662_v22 }
 0x1e1   : > { %910 = vmatmul.msk.f32.vlgmr.msrb.gmra.mxu1 %vm518_vm3, %v669_v19 }
 0x259   : > { %v702_v24 = vpop.f32.mrf.mxu0 }
 0x25a   : > { %v703_v25 = vadd.f32 %v702_v24, %v674_v23 }
 0x25c   : > { %v726_v26 = vsel %vm725_vm4, %v703_v25, -inf }
 0x25d   : > { %v727_v27 = vrot.slane %v726_v26, 4 }
 0x25e   : > { %v722_v28 = vpop.f32.mrf.mxu1 }
 0x25f   : > { %v728_v29 = vmax.f32 %v726_v26, %v727_v27  ;;  %v723_v30 = vadd.f32 %v722_v28, %v674_v23 }
 0x261   : > { %v729_v31 = vrot.slane %v728_v29, 2  ;;  %v733_v32 = vsel %vm725_vm4, %v723_v30, -inf }
 0x262   : > { %v734_v33 = vrot.slane %v733_v32, 4 }
 0x263   : > { %v730_v34 = vmax.f32 %v728_v29, %v729_v31 }
 0x264   : > { %v735_v35 = vmax.f32 %v733_v32, %v734_v33 }
 0x265   : > { %v731_v36 = vrot.slane %v730_v34, 1 }
 0x266   : > { %v736_v37 = vrot.slane %v735_v35, 2 }
 0x267   : > { %v732_v38 = vmax.f32 %v730_v34, %v731_v36 }
 0x268   : > { %v737_v39 = vmax.f32 %v735_v35, %v736_v37 }
 0x269   : > { %v740_v40 = vsub.f32 %v703_v25, %v732_v38 }
 0x26a   : > { %v738_v41 = vrot.slane %v737_v39, 1 }
 0x26b   : > { %v742_v42 = vmul.f32 1.442695, %v740_v40 }
 0x26c   : > { %v739_v43 = vmax.f32 %v737_v39, %v738_v41 }
 0x26d   : > { %1001 = vpow2.f32 %v742_v42 }
 0x26e   : > { %v741_v44 = vsub.f32 %v723_v30, %v739_v43 }
 0x270   : > { %v744_v45 = vmul.f32 1.442695, %v741_v44 }
 0x272   : > { %1003 = vpow2.f32 %v744_v45 }
 0x273   : > { %v1002_v46 = vpop.eup %1001 }
 0x274   : > { %v746_v47 = vsel %vm725_vm4, %v1002_v46, 0.0 }
 0x275   : > { %v747_v48 = vrot.slane %v746_v47, 4 }
 0x277   : > { %v748_v49 = vadd.f32 %v747_v48, %v746_v47 }
 0x278   : > { %v1004_v50 = vpop.eup %1003 }
 0x279   : > { %v749_v51 = vrot.slane %v748_v49, 2  ;;  %v753_v52 = vsel %vm725_vm4, %v1004_v50, 0.0 }
 0x27a   : > { %v754_v53 = vrot.slane %v753_v52, 4 }
 0x27b   : > { %v750_v54 = vadd.f32 %v749_v51, %v748_v49 }
 0x27c   : > { %v755_v55 = vadd.f32 %v754_v53, %v753_v52 }
 0x27d   : > { %v751_v56 = vrot.slane %v750_v54, 1 }
 0x27e   : > { %v756_v57 = vrot.slane %v755_v55, 2 }
 0x27f   : > { %v752_v58 = vadd.f32 %v751_v56, %v750_v54 }
 0x280   : > { %v757_v59 = vadd.f32 %v756_v57, %v755_v55 }
 0x281   : > { %1005 = vrcp.f32 %v752_v58  ;;  %vm765_vm6 = vweird.f32 %v752_v58  ;;  %v771_v6 = vand.u32 2147483648, %v752_v58  ;;  %v769_v8 = vand.u32 2147483647, %v752_v58 }
 0x282   : > { %v758_v60 = vrot.slane %v757_v59, 1 }
 0x283   : > { %v772_v13 = vor.u32 1.1754944e-38, %v771_v6  ;;  %vm770_vm11 = vcmp.eq.f32.partialorder %v769_v8, 8.507059e+37 }
 0x284   : > { %v759_v61 = vadd.f32 %v758_v60, %v757_v59 }
 0x286   : > { %1007 = vrcp.f32 %v759_v61  ;;  %v786_v7 = vand.u32 2147483648, %v759_v61  ;;  %v784_v10 = vand.u32 2147483647, %v759_v61  ;;  %vm780_vm9 = vweird.f32 %v759_v61 }
 0x287   : > { %v1006_v62 = vpop.eup %1005 }
 0x288   : > { %v761_v63 = vmul.f32 %v1006_v62, %v752_v58  ;;  %vm766_vm5 = vweird.f32 %v1006_v62  ;;  %v787_v14 = vor.u32 1.1754944e-38, %v786_v7  ;;  %vm785_vm12 = vcmp.eq.f32.partialorder %v784_v10, 8.507059e+37 }
 0x289   : > { %vm767_vm8 = vmor %vm765_vm6, %vm766_vm5 }
 0x28a   : > { %v762_v0 = vsub.f32 1.0, %v761_v63 }
 0x28c   : > { %v1008_v1 = vpop.eup %1007  ;;  %v763_v2 = vmul.f32 %v1006_v62, %v762_v0 }
 0x28d   : > { %v776_v3 = vmul.f32 %v1008_v1, %v759_v61  ;;  %vm781_vm7 = vweird.f32 %v1008_v1 }
 0x28e   : > { %v764_v4 = vadd.f32 %v1006_v62, %v763_v2  ;;  %vm782_vm10 = vmor %vm780_vm9, %vm781_vm7 }
 0x28f   : > { %v777_v5 = vsub.f32 1.0, %v776_v3 }
 0x290   : > { %v768_v11 = vsel %vm767_vm8, %v1006_v62, %v764_v4 }
 0x291   : > { %v778_v9 = vmul.f32 %v1008_v1, %v777_v5  ;;  %v773_v16 = vsel %vm770_vm11, %v772_v13, %v768_v11 }
 0x292   : > { %v774_v19 = vmul.f32 %v1002_v46, %v773_v16 }
 0x293   : > { %v779_v12 = vadd.f32 %v1008_v1, %v778_v9 }
 0x295   : > { %v783_v15 = vsel %vm782_vm10, %v1008_v1, %v779_v12 }
 0x296   : > { %v788_v17 = vsel %vm785_vm12, %v787_v14, %v783_v15 }
 0x297   : > { %v789_v18 = vmul.f32 %v1004_v50, %v788_v17 }
 0x299   : > { %v792_v20 = vrot.slane %v789_v18, 4 }
 0x29b   : > { %v793_v21 = vsel %vm725_vm4, %v774_v19, %v792_v20 }
 0x29c   : > { %795 = vst [vmem:[%s302_s28] sm:$0xff] %v793_v21 }
 0x29d   : > { %1036 = shalt.err (!%p1033_p5)
}
 0x29e   : > { %918 = dma.vmem_to_hbm [thread:$0]  (%p1152_p6), %s811_s8, 128, %s813_s9, %s797_s13  }
 0x29f PF: > { %s824_s20 = sand.u32 1, %s1059_s24   ;;  %p921_p7 = pnand %p880_p9, %p1156_p8 }
 0x2a0   : > { %s825_s22 = scalar_lea.sflag [#allocation4], %s824_s20 }
 0x2a1   : > { %p922_p10 = pneg %p921_p7 }
 0x2a3   : > { %1054 = dma.done.wait (%p922_p10), %s825_s22, 128  }
 0x2a4   : > { %1056 = vsyncadd (%p922_p10), %s825_s22, 4294967168  ;;  %p17_p11 = scmp.ge.s32.totalorder %s1137_s30, 4   ;;  %s1308_s24 = smov %s1063_s25 }
 0x2a5   : > { %s1309_s25 = smov %s1067_s26  ;;  %s1310_s26 = smov %s1150_s10 }
 0x2a6   : > { %s1311_s27 = smov %s1137_s30  ;;  %19 = sbr.rel (!%p17_p11) target bundleno = 3 (0x3), region = 111 }
 0x2ab   :  { %831 = vsyncpa [#allocation4], 1 }
 0x2ac   :  { %833 = vsyncpa [#allocation4 + $0x1], 1 }

</bundles_post_ra>
